<compile_context>
chip_gen: v6e
topology: v6e:2x2x1
jax: 0.10.0
libtpu: 0.0.40
codegen_flags: <defaults>
</compile_context>

<pallas_src>
import jax
import jax.numpy as jnp
from jax.experimental import pallas as pl
from jax.experimental.pallas import tpu as pltpu


def _mish_kernel(x_ref, o_ref):
    x = x_ref[...].astype(jnp.float32)
    # tanh(softplus(x)) = (e^{2x} + 2 e^x) / (e^{2x} + 2 e^x + 2)
    # Rescale by e^{-2|x|} so only z = exp(-|x|) in (0, 1] is needed (never
    # overflows):
    #   x >= 0: num = 1 + 2z,      den = num + 2z^2
    #   x <  0: num = z^2 + 2z,    den = num + 2
    z = jnp.exp(-jnp.abs(x))                 # single EUP transcendental
    z2 = z * z
    pos = x >= 0.0
    num = jnp.where(pos, 1.0 + 2.0 * z, z2 + 2.0 * z)
    den = num + jnp.where(pos, 2.0 * z2, 2.0)   # den in [1, 5] -> safe recip
    r = pl.reciprocal(den, approx=True)
    r = r * (2.0 - den * r)                  # one Newton step -> ~f32 accuracy
    o_ref[...] = (x * num * r).astype(o_ref.dtype)


def mish(x, *, tile_rows=2048):
    """Elementwise Mish via a Pallas TPU kernel. Works for any shape/dtype."""
    orig_shape = x.shape
    orig_dtype = x.dtype
    n = x.size
    lanes = 128

    flat = jnp.ravel(x)
    pad = (-n) % lanes                      # pad only to the 128-lane boundary
    if pad:
        flat = jnp.concatenate([flat, jnp.zeros((pad,), dtype=orig_dtype)])
    rows = (n + pad) // lanes
    x2d = flat.reshape(rows, lanes)

    # ~1 MiB f32 blocks; shrink (to a multiple of 8 sublanes) for tiny inputs.
    block_rows = min(tile_rows, ((rows + 7) // 8) * 8)
    grid = (pl.cdiv(rows, block_rows),)     # partial last block masked by Pallas

    out2d = pl.pallas_call(
        _mish_kernel,
        out_shape=jax.ShapeDtypeStruct((rows, lanes), orig_dtype),
        grid_spec=pltpu.PrefetchScalarGridSpec(
            num_scalar_prefetch=0,
            grid=grid,
            in_specs=[pl.BlockSpec((block_rows, lanes), lambda i: (i, 0))],
            out_specs=pl.BlockSpec((block_rows, lanes), lambda i: (i, 0)),
        ),
        compiler_params=pltpu.CompilerParams(
            dimension_semantics=("parallel",),
        ),
    )(x2d)

    out_flat = out2d.reshape(-1)
    if pad:
        out_flat = out_flat[:n]
    return out_flat.reshape(orig_shape)


def _mish_ref(x):
    xf = x.astype(jnp.float32)
    return (xf * jnp.tanh(jax.nn.softplus(xf))).astype(x.dtype)


if __name__ == "__main__":
    key = jax.random.PRNGKey(0)
    # Shape consistent with Mish's "(N, *)" contract — NCHW-like tensor.
    x = jax.random.normal(key, (2, 4, 16, 16), dtype=jnp.float32)

    y = mish(x)
    y = jax.block_until_ready(y)

    y_ref = _mish_ref(x)
    assert y.shape == x.shape and y.dtype == x.dtype
    assert jnp.allclose(y, y_ref, atol=1e-5, rtol=1e-5)

    print("KERNEL_OK")
</pallas_src>

<mosaic_0001>
module attributes {stable_mosaic.version = 11 : i64} {
  func.func @_mish_kernel(%arg0: i32, %arg1: memref<16x128xf32, #tpu.memory_space<vmem>>, %arg2: memref<16x128xf32, #tpu.memory_space<vmem>>) attributes {dimension_semantics = [#tpu.dimension_semantics<parallel>], iteration_bounds = array<i64: 1>, scalar_prefetch = 0 : i64, scratch_operands = 0 : i64, tpu.core_type = #tpu.core_type<tc>, window_params = [{transform_indices = @transform_0, window_bounds = array<i64: 16, 128>}, {transform_indices = @transform_1, window_bounds = array<i64: 16, 128>}]} {
    %c0 = arith.constant 0 : index
    %c0_0 = arith.constant 0 : index
    %0 = vector.load %arg1[%c0, %c0_0] : memref<16x128xf32, #tpu.memory_space<vmem>>, vector<16x128xf32>
    %1 = math.absf %0 : vector<16x128xf32>
    %cst = arith.constant 0.000000e+00 : f32
    %2 = vector.broadcast %cst : f32 to vector<16x128xf32>
    %3 = arith.subf %2, %1 : vector<16x128xf32>
    %4 = math.exp %3 : vector<16x128xf32>
    %5 = arith.mulf %4, %4 : vector<16x128xf32>
    %cst_1 = arith.constant 0.000000e+00 : f32
    %6 = vector.broadcast %cst_1 : f32 to vector<16x128xf32>
    %7 = arith.cmpf oge, %0, %6 : vector<16x128xf32>
    %cst_2 = arith.constant 2.000000e+00 : f32
    %8 = vector.broadcast %cst_2 : f32 to vector<16x128xf32>
    %9 = arith.mulf %8, %4 : vector<16x128xf32>
    %cst_3 = arith.constant 1.000000e+00 : f32
    %10 = vector.broadcast %cst_3 : f32 to vector<16x128xf32>
    %11 = arith.addf %10, %9 : vector<16x128xf32>
    %cst_4 = arith.constant 2.000000e+00 : f32
    %12 = vector.broadcast %cst_4 : f32 to vector<16x128xf32>
    %13 = arith.mulf %12, %4 : vector<16x128xf32>
    %14 = arith.addf %5, %13 : vector<16x128xf32>
    %15 = arith.select %7, %11, %14 : vector<16x128xi1>, vector<16x128xf32>
    %cst_5 = arith.constant 2.000000e+00 : f32
    %16 = vector.broadcast %cst_5 : f32 to vector<16x128xf32>
    %17 = arith.mulf %16, %5 : vector<16x128xf32>
    %cst_6 = arith.constant 2.000000e+00 : f32
    %18 = vector.broadcast %cst_6 : f32 to vector<16x128xf32>
    %19 = arith.select %7, %17, %18 : vector<16x128xi1>, vector<16x128xf32>
    %20 = arith.addf %15, %19 : vector<16x128xf32>
    %21 = tpu.reciprocal %20 {approx = true} : vector<16x128xf32> -> vector<16x128xf32>
    %22 = arith.mulf %20, %21 : vector<16x128xf32>
    %cst_7 = arith.constant 2.000000e+00 : f32
    %23 = vector.broadcast %cst_7 : f32 to vector<16x128xf32>
    %24 = arith.subf %23, %22 : vector<16x128xf32>
    %25 = arith.mulf %21, %24 : vector<16x128xf32>
    %26 = arith.mulf %0, %15 : vector<16x128xf32>
    %27 = arith.mulf %26, %25 : vector<16x128xf32>
    %c0_8 = arith.constant 0 : index
    %c0_9 = arith.constant 0 : index
    %28 = vector.load %arg2[%c0_8, %c0_9] : memref<16x128xf32, #tpu.memory_space<vmem>>, vector<16x128xf32>
    tpu.vector_store %arg2[%c0_8, %c0_9], %27 {strides = array<i32>} : memref<16x128xf32, #tpu.memory_space<vmem>>, vector<16x128xf32>,
    return
  }
  func.func @transform_0(%arg0: i32) -> (i32, i32) {
    %c0_i32 = arith.constant 0 : i32
    %c0_i32_0 = arith.constant 0 : i32
    return %arg0, %c0_i32 : i32, i32
  }
  func.func @transform_1(%arg0: i32) -> (i32, i32) {
    %c0_i32 = arith.constant 0 : i32
    %c0_i32_0 = arith.constant 0 : i32
    return %arg0, %c0_i32 : i32, i32
  }
}

</mosaic_0001>

<bundles_post_ra>
// kernel: tpu_custom_call.1
= control target key start
LH: loop header
LB: loop body
LE: loop exit
PB: predicated region body
PF: predicated region fallthrough
CT: control target
= control target key end

     0   :  { %6 = vsyncpa [#allocation3], 0  ;;  %s164_s0 = inlined_call_operand.hbm [shape: f32[16,128], index: 0, kind: input, shape index: {}]   ;;  %s165_s1 = inlined_call_operand.hbm [shape: f32[16,128], index: 1, kind: output, shape index: {}]  }
   0x1   :  { %7 = vsyncpa [#allocation4], 0  ;;  %s138_s6 = smov [#allocation2]  }
   0x2   :  { %s13_s7 = sshll.u32 %s138_s6, 4  ;;  %s14_s7 = int_to_ptr.vmem [resolvable:$true] %s13_s7 }
   0x3   :  { %s102_s8 = scalar_lea.vmem %s14_s7, 256  ;;  %p107_p1 = scmp.lt.s32.totalorder %s14_s7, %s14_s7 }
   0x4   :  { %p103_p0 = scmp.ne.s32.totalorder %s14_s7, %s102_s8  ;;  %p108_p2 = scmp.lt.s32.totalorder %s102_s8, %s102_s8 }
   0x6   :  { %p109_p3 = por %p108_p2, %p107_p1 }
   0x8   :  { %p110_p4 = pnand %p109_p3, %p103_p0 }
   0xa   :  { %113 = shalt.err (!%p110_p4)
}
   0xb   :  { %s139_s9 = smov 128   ;;  %s140_s10 = smov 8  }
   0xc   :  { %19 = dma.hbm_to_vmem [thread:$0]  %s164_s0, 256, %s14_s7, [#allocation3], %s139_s9, %s139_s9, %s140_s10  }
   0xd   :  { %134 = dma.done.wait [#allocation3], 256  }
   0xe   :  { %135 = vsyncadd [#allocation3], 4294967040  ;;  %v23_v0 = vld [vmem:[#allocation2] sm:$0xff]  ;;  %v24_v1 = vld [vmem:[#allocation2 + $0x8] sm:$0xff]  ;;  %s141_s0 = smov [#allocation5]  }
   0xf   :  { %v25_v2 = vand.u32 2147483647, %v23_v0  ;;  %v26_v3 = vand.u32 2147483647, %v24_v1  ;;  %vm35_vm0 = vcmp.ge.f32.partialorder %v23_v0, 0.0  ;;  %vm36_vm1 = vcmp.ge.f32.partialorder %v24_v1, 0.0 }
  0x10   :  { %s70_s13 = sshll.u32 %s141_s0, 4  ;;  %s71_s13 = int_to_ptr.vmem [resolvable:$true] %s70_s13 }
  0x11   :  { %v27_v4 = vsub.f32 0.0, %v25_v2  ;;  %v28_v5 = vsub.f32 0.0, %v26_v3  ;;  %s114_s14 = scalar_lea.vmem %s71_s13, 256  ;;  %p119_p6 = scmp.lt.s32.totalorder %s71_s13, %s71_s13 }
  0x12   :  { %p115_p5 = scmp.ne.s32.totalorder %s71_s13, %s114_s14  ;;  %p120_p7 = scmp.lt.s32.totalorder %s114_s14, %s114_s14 }
  0x13   :  { %v29_v6 = vmul.f32 1.442695, %v27_v4  ;;  %v31_v7 = vmul.f32 1.442695, %v28_v5 }
  0x14   :  { %p121_p8 = por %p120_p7, %p119_p6 }
  0x15   :  { %86 = vpow2.f32 %v29_v6 }
  0x16   :  { %88 = vpow2.f32 %v31_v7  ;;  %p122_p9 = pnand %p121_p8, %p115_p5 }
  0x22   :  { %v87_v8 = vpop.eup %86 }
  0x23   :  { %v89_v9 = vpop.eup %88  ;;  %v33_v10 = vmul.f32 %v87_v8, %v87_v8  ;;  %v37_v11 = vmul.f32 2.0, %v87_v8 }
  0x24   :  { %v34_v12 = vmul.f32 %v89_v9, %v89_v9  ;;  %v38_v13 = vmul.f32 2.0, %v89_v9 }
  0x25   :  { %v39_v14 = vadd.f32 1.0, %v37_v11  ;;  %v41_v15 = vadd.f32 %v37_v11, %v33_v10  ;;  %v45_v16 = vmul.f32 2.0, %v33_v10 }
  0x26   :  { %v40_v17 = vadd.f32 1.0, %v38_v13  ;;  %v42_v18 = vadd.f32 %v38_v13, %v34_v12  ;;  %v46_v19 = vmul.f32 2.0, %v34_v12 }
  0x27   :  { %v43_v20 = vsel %vm35_vm0, %v39_v14, %v41_v15  ;;  %v47_v21 = vsel %vm35_vm0, %v45_v16, 2.0 }
  0x28   :  { %v49_v22 = vadd.f32 %v47_v21, %v43_v20  ;;  %v44_v23 = vsel %vm36_vm1, %v40_v17, %v42_v18  ;;  %v48_v24 = vsel %vm36_vm1, %v46_v19, 2.0  ;;  %v59_v31 = vmul.f32 %v43_v20, %v23_v0 }
  0x29   :  { %v50_v25 = vadd.f32 %v48_v24, %v44_v23  ;;  %v60_v33 = vmul.f32 %v44_v23, %v24_v1 }
  0x2a   :  { %90 = vrcp.f32 %v49_v22 }
  0x2b   :  { %92 = vrcp.f32 %v50_v25 }
  0x37   :  { %v91_v26 = vpop.eup %90 }
  0x38   :  { %v93_v27 = vpop.eup %92  ;;  %v53_v28 = vmul.f32 %v91_v26, %v49_v22 }
  0x39   :  { %v54_v29 = vmul.f32 %v93_v27, %v50_v25 }
  0x3a   :  { %v55_v30 = vsub.f32 2.0, %v53_v28 }
  0x3b   :  { %v56_v32 = vsub.f32 2.0, %v54_v29 }
  0x3c   :  { %v57_v34 = vmul.f32 %v91_v26, %v55_v30 }
  0x3d   :  { %v58_v35 = vmul.f32 %v93_v27, %v56_v32 }
  0x3e   :  { %v61_v36 = vmul.f32 %v59_v31, %v57_v34 }
  0x3f   :  { %v62_v37 = vmul.f32 %v60_v33, %v58_v35 }
  0x40   :  { %63 = vst [vmem:[#allocation5] sm:$0xff] %v61_v36 }
  0x41   :  { %64 = vst [vmem:[#allocation5 + $0x8] sm:$0xff] %v62_v37 }
  0x42   :  { %125 = shalt.err (!%p122_p9)
}
  0x43   :  { %76 = dma.vmem_to_hbm [thread:$0]  %s71_s13, 256, %s165_s1, [#allocation4], %s139_s9, %s139_s9, %s140_s10  }
  0x44   :  { %136 = dma.done.wait [#allocation4], 256  }
  0x45   :  { %137 = vsyncadd [#allocation4], 4294967040 }
  0x46   :  { %80 = vsyncpa [#allocation3], 1 }
  0x47   :  { %81 = vsyncpa [#allocation4], 1 }

</bundles_post_ra>
